<compile_context>
chip_gen: v7x
topology: tpu7x:2x2x1
jax: 0.10.0
libtpu: 0.0.40
codegen_flags: <defaults>
</compile_context>

<pallas_src>
import functools
import math

import numpy as np
import jax
import jax.numpy as jnp
from jax.experimental import pallas as pl
from jax.experimental.pallas import tpu as pltpu


# --------------------------------------------------------------------------
# Pallas kernel: grid = (batch, A-tile). Lane-dense layout (A on lanes).
# --------------------------------------------------------------------------
def _loss_kernel(num_pos_ref,                      # SMEM (B,) i32  (scalar prefetch)
                 cls_ref,                          # (1, C, TA) f32
                 regbox_ref,                       # (1, 8, TA) f32  rows 0-3 reg, 4-7 gt box
                 gtc_ref,                          # (1, 1, TA) i32
                 lp_ref,                           # (1, C, 128) f32 label_present (lane bcast)
                 anc_ref,                          # (8, TA) f32 [acx,acy,1/aw,1/ah,log aw,log ah,0,0]
                 cls_out_ref,                      # (1, 8, 128) f32 per-batch partial sum
                 reg_out_ref,                      # (1, 8, 128) f32 per-batch partial sum
                 *, alpha, gamma):
    b = pl.program_id(0)
    t = pl.program_id(1)

    # -- zero the per-batch accumulators on the first A-tile ----------------
    @pl.when(t == 0)
    def _init():
        cls_out_ref[...] = jnp.zeros_like(cls_out_ref)
        reg_out_ref[...] = jnp.zeros_like(reg_out_ref)

    n_pos = num_pos_ref[b]
    has_pos = n_pos > 0

    cls = jnp.clip(cls_ref[0], 1e-4, 1.0 - 1e-4)            # (C, TA)
    tcls = gtc_ref[0]                                        # (1, TA) i32
    pos = tcls > 0                                           # (1, TA)
    nonneg = tcls >= 0                                       # (1, TA)

    # 2 logs + 1 exp per element: the EUP-bound core, shared by both cases.
    logc = jnp.log(cls)                                      # (C, TA)
    log1mc = jnp.log(1.0 - cls)                              # (C, TA)

    # label_present precomputed in the wrapper (union over positive anchors).
    lp = lp_ref[0][:, :1] > 0.5                              # (C, 1)
    is_one = jnp.logical_and(pos, lp)                        # (C, TA)

    # Unified focal loss: with no positives, is_one is all-False and this
    # reduces exactly to (1-alpha) * c**gamma * (-log(1-c)).
    alpha_factor = jnp.where(is_one, alpha, 1.0 - alpha)
    focal = alpha_factor * jnp.exp(gamma * jnp.where(is_one, log1mc, logc))
    bce = -jnp.where(is_one, logc, log1mc)
    # has_pos case masks ignore anchors (label -1) and lane padding; the
    # no-positive case sums every entry (padded-lane contribution ~1e-14).
    keep = jnp.logical_or(nonneg, jnp.logical_not(has_pos))
    cls_out_ref[...] += jnp.sum(jnp.where(keep, focal * bce, 0.0))

    # -------- box regression (smooth L1 over positive anchors) -------------
    @pl.when(has_pos)
    def _reg():
        rb = regbox_ref[0]                                   # (8, TA)
        anc = anc_ref[...]                                   # (8, TA)
        reg = rb[0:4]                                        # (4, TA)
        gtb = rb[4:8]                                        # (4, TA)

        gsz = gtb[2:4] - gtb[0:2]                            # (2, TA)  gw, gh
        gc = gtb[0:2] + 0.5 * gsz                            # (2, TA)  gcx, gcy

        t01 = (gc - anc[0:2]) * anc[2:4]                     # (dx, dy)
        t23 = jnp.log(jnp.where(pos, gsz, 1.0)) - anc[4:6]   # (log dw, log dh)

        def sl1(d):
            return jnp.where(d < 1.0, 0.5 * d * d, d - 0.5)

        per_anchor = sl1(jnp.abs(t01 - reg[0:2])) + sl1(jnp.abs(t23 - reg[2:4]))
        reg_out_ref[...] += jnp.sum(jnp.where(pos, per_anchor, 0.0))


# --------------------------------------------------------------------------
# Tile / VMEM-limit selection (generation-aware).
# --------------------------------------------------------------------------
def _choose_tile(A, C):
    a128 = -(-A // 128) * 128
    try:
        vmem_bytes = int(getattr(pltpu.get_tpu_info(), "vmem_capacity_bytes",
                                 64 * 1024 * 1024))
    except Exception:
        vmem_bytes = 64 * 1024 * 1024                         # v7x-safe fallback
    budget = int(vmem_bytes * 0.4)                            # headroom for dbl-buffering
    # double-buffered f32 bytes per A column: cls C rows + reg/box 8 + gtc 1 + anchors 8
    per_col = 2 * 4 * (C + 8 + 1 + 8)
    ta_max = max(128, min((budget // per_col) // 128 * 128, 16384, a128))
    n_at = max(1, math.ceil(a128 / ta_max))
    ta = math.ceil(a128 / n_at / 128) * 128
    a_pad = n_at * ta
    vmem_limit = int(min(vmem_bytes - (8 << 20),
                         max(32 << 20, 4 * per_col * ta)))
    return ta, a_pad, n_at, vmem_limit


# --------------------------------------------------------------------------
# Wrapper
# --------------------------------------------------------------------------
def loss_func(classifications, regressions, anchors, gt_clss, gt_bboxes,
              alpha=0.25, gamma=2.5):
    B, A, C = classifications.shape
    TA, A_pad, n_at, vmem_limit = _choose_tile(A, C)
    pad = A_pad - A

    # -- per-batch scalars / per-class union, hoisted out of the kernel -----
    gtc_flat = gt_clss[..., 0].astype(jnp.int32)              # (B, A)
    pos_flat = gtc_flat > 0
    num_pos = jnp.sum(pos_flat, axis=1).astype(jnp.int32)     # (B,)
    onehot = jnp.logical_and(
        pos_flat[:, :, None],
        gtc_flat[:, :, None] == jnp.arange(1, C + 1, dtype=jnp.int32)[None, None, :])
    label_present = jnp.any(onehot, axis=1)                   # (B, C)
    lp_arr = jnp.broadcast_to(
        label_present.astype(jnp.float32)[:, :, None], (B, C, 128))

    # -- lane-dense layout: big A axis last ----------------------------------
    cls_t = jnp.transpose(classifications, (0, 2, 1))          # (B, C, A)
    regbox = jnp.concatenate(
        [jnp.transpose(regressions, (0, 2, 1)),
         jnp.transpose(gt_bboxes, (0, 2, 1))], axis=1)         # (B, 8, A)
    gtc_t = jnp.transpose(gt_clss, (0, 2, 1)).astype(jnp.int32)  # (B, 1, A)

    # anchor decode + reciprocal / log hoisted (batch-invariant), 8 sublanes
    anc = anchors[0]                                           # (A, 4)
    aw = anc[:, 2] - anc[:, 0]
    ah = anc[:, 3] - anc[:, 1]
    acx = anc[:, 0] + 0.5 * aw
    acy = anc[:, 1] + 0.5 * ah
    zeros = jnp.zeros_like(aw)
    anc_dec = jnp.stack([acx, acy, 1.0 / aw, 1.0 / ah,
                         jnp.log(aw), jnp.log(ah), zeros, zeros], axis=0)  # (8, A)

    if pad:
        cls_t = jnp.pad(cls_t, ((0, 0), (0, 0), (0, pad)), constant_values=1e-4)
        regbox = jnp.pad(regbox, ((0, 0), (0, 0), (0, pad)))
        gtc_t = jnp.pad(gtc_t, ((0, 0), (0, 0), (0, pad)), constant_values=-1)
        anc_dec = jnp.pad(anc_dec, ((0, 0), (0, pad)))

    kernel = functools.partial(_loss_kernel, alpha=float(alpha), gamma=float(gamma))

    grid_spec = pltpu.PrefetchScalarGridSpec(
        num_scalar_prefetch=1,
        grid=(B, n_at),
        in_specs=[
            pl.BlockSpec((1, C, TA), lambda b, t, npos: (b, 0, t)),   # classifications
            pl.BlockSpec((1, 8, TA), lambda b, t, npos: (b, 0, t)),   # regression + gt box
            pl.BlockSpec((1, 1, TA), lambda b, t, npos: (b, 0, t)),   # gt classes
            pl.BlockSpec((1, C, 128), lambda b, t, npos: (b, 0, 0)),  # label_present
            pl.BlockSpec((8, TA), lambda b, t, npos: (0, t)),         # decoded anchors
        ],
        out_specs=[
            pl.BlockSpec((1, 8, 128), lambda b, t, npos: (b, 0, 0)),  # per-batch cls sum
            pl.BlockSpec((1, 8, 128), lambda b, t, npos: (b, 0, 0)),  # per-batch reg sum
        ],
    )

    cls_part, reg_part = pl.pallas_call(
        kernel,
        grid_spec=grid_spec,
        out_shape=[
            jax.ShapeDtypeStruct((B, 8, 128), jnp.float32),
            jax.ShapeDtypeStruct((B, 8, 128), jnp.float32),
        ],
        compiler_params=pltpu.CompilerParams(
            # batch axis parallel (both TensorCores on v7x); A-tile axis is the
            # accumulation axis -> arbitrary, last.
            dimension_semantics=("parallel", "arbitrary"),
            vmem_limit_bytes=vmem_limit),
    )(num_pos, cls_t, regbox, gtc_t, lp_arr, anc_dec)

    # -- per-batch normalization + batch mean (tiny, done in XLA) ------------
    num_pos_f = num_pos.astype(jnp.float32)
    has_pos = num_pos_f > 0.0
    cls_sum = cls_part[:, 0, 0]
    reg_sum = reg_part[:, 0, 0]
    cls_per = jnp.where(has_pos, cls_sum / jnp.maximum(num_pos_f, 1.0),
                        cls_sum / 100.0)
    reg_per = jnp.where(has_pos, reg_sum / jnp.maximum(4.0 * num_pos_f, 1.0), 0.0)
    cls_loss = jnp.mean(cls_per, keepdims=True)                # (1,) keepdim, like PyTorch
    reg_loss = jnp.mean(reg_per, keepdims=True)
    return cls_loss, reg_loss


# --------------------------------------------------------------------------
# Pure-numpy reference (mirrors the PyTorch forward, incl. broadcast indexing)
# --------------------------------------------------------------------------
def _reference(classifications, regressions, anchors, gt_clss, gt_bboxes,
               alpha=0.25, gamma=2.5):
    cls_all = np.asarray(classifications, np.float32)
    reg_all = np.asarray(regressions, np.float32)
    anc = np.asarray(anchors, np.float32)[0]
    gtc_all = np.asarray(gt_clss)
    gtb_all = np.asarray(gt_bboxes, np.float32)
    B = cls_all.shape[0]
    cls_losses, reg_losses = [], []
    for j in range(B):
        c = np.clip(cls_all[j], 1e-4, 1.0 - 1e-4)
        tcls = gtc_all[j]                                   # (A,1)
        pos = (tcls > 0).reshape(-1)
        nonneg = (tcls >= 0).reshape(-1)
        npos = int(pos.sum())
        if npos == 0:
            fw = (1.0 - alpha) * np.power(c, gamma)
            cls_losses.append(float((fw * -np.log(1.0 - c)).sum() / 100.0))
            reg_losses.append(0.0)
            continue
        targets = np.full(c.shape, -1.0, np.float32)
        targets[nonneg, :] = 0.0
        rows = np.nonzero(pos)[0]                           # (P,)
        cols = tcls[pos] - 1                                # (P,1) -> broadcast to (P,P)
        targets[rows, cols] = 1.0
        af = np.where(targets == 1.0, alpha, 1.0 - alpha)
        fw = np.where(targets == 1.0, 1.0 - c, c)
        fw = af * np.power(fw, gamma)
        bce = -(targets * np.log(c) + (1.0 - targets) * np.log(1.0 - c))
        cl = np.where(targets != -1.0, fw * bce, 0.0)
        cls_losses.append(float(cl.sum() / max(npos, 1.0)))
        a = anc[pos]
        g = gtb_all[j][pos]
        r = reg_all[j][pos]
        aw, ah = a[:, 2] - a[:, 0], a[:, 3] - a[:, 1]
        acx, acy = a[:, 0] + 0.5 * aw, a[:, 1] + 0.5 * ah
        gw, gh = g[:, 2] - g[:, 0], g[:, 3] - g[:, 1]
        gcx, gcy = g[:, 0] + 0.5 * gw, g[:, 1] + 0.5 * gh
        t = np.stack([(gcx - acx) / aw, (gcy - acy) / ah,
                      np.log(gw / aw), np.log(gh / ah)], axis=1)
        d = np.abs(t - r)
        rl = np.where(d < 1.0, 0.5 * d * d, d - 0.5)
        reg_losses.append(float(rl.mean()))
    return np.mean(cls_losses), np.mean(reg_losses)


# --------------------------------------------------------------------------
if __name__ == "__main__":
    B, A, C = 2, 64, 8
    key = jax.random.PRNGKey(0)
    k1, k2, k3, k4, k5, k6, k7 = jax.random.split(key, 7)

    classifications = jax.random.uniform(k1, (B, A, C), jnp.float32, 0.02, 0.98)
    regressions = jax.random.normal(k2, (B, A, 4), jnp.float32) * 0.1

    axy = jax.random.uniform(k3, (A, 2), jnp.float32, 0.0, 50.0)
    awh = jax.random.uniform(k4, (A, 2), jnp.float32, 5.0, 30.0)
    anchors = jnp.concatenate([axy, axy + awh], axis=1)[None]        # (1, A, 4)

    gxy = jax.random.uniform(k5, (B, A, 2), jnp.float32, 0.0, 50.0)
    gwh = jax.random.uniform(k6, (B, A, 2), jnp.float32, 5.0, 30.0)
    gt_bboxes = jnp.concatenate([gxy, gxy + gwh], axis=2)            # (B, A, 4)

    # batch 0: mixed labels (-1 ignore, 0 negative, 1..C positive)
    # batch 1: all-zero labels -> exercises the "no positive anchors" branch
    gtc0 = jax.random.randint(k7, (1, A, 1), -1, C + 1).astype(jnp.int32)
    gtc1 = jnp.zeros((1, A, 1), jnp.int32)
    gt_clss = jnp.concatenate([gtc0, gtc1], axis=0)                  # (B, A, 1)

    cls_loss, reg_loss = loss_func(classifications, regressions, anchors,
                                   gt_clss, gt_bboxes)
    jax.block_until_ready((cls_loss, reg_loss))

    ref_cls, ref_reg = _reference(classifications, regressions, anchors,
                                  gt_clss, gt_bboxes)
    np.testing.assert_allclose(np.asarray(cls_loss)[0], ref_cls, rtol=2e-3, atol=1e-4)
    np.testing.assert_allclose(np.asarray(reg_loss)[0], ref_reg, rtol=2e-3, atol=1e-4)

    print("KERNEL_OK")
</pallas_src>

<mosaic_0001>
module attributes {stable_mosaic.version = 11 : i64} {
  func.func @_loss_kernel(%arg0: i32, %arg1: i32, %arg2: memref<2xi32, #tpu.memory_space<smem>>, %arg3: memref<1x8x128xf32, #tpu.memory_space<vmem>>, %arg4: memref<1x8x128xf32, #tpu.memory_space<vmem>>, %arg5: memref<1x1x128xi32, #tpu.memory_space<vmem>>, %arg6: memref<1x8x128xf32, #tpu.memory_space<vmem>>, %arg7: memref<8x128xf32, #tpu.memory_space<vmem>>, %arg8: memref<1x8x128xf32, #tpu.memory_space<vmem>>, %arg9: memref<1x8x128xf32, #tpu.memory_space<vmem>>) attributes {dimension_semantics = [#tpu.dimension_semantics<parallel>, #tpu.dimension_semantics<arbitrary>], iteration_bounds = array<i64: 2, 1>, scalar_prefetch = 1 : i64, scratch_operands = 0 : i64, tpu.core_type = #tpu.core_type<tc>, window_params = [{transform_indices = @transform_0, window_bounds = array<i64: 1, 8, 128>}, {transform_indices = @transform_1, window_bounds = array<i64: 1, 8, 128>}, {transform_indices = @transform_2, window_bounds = array<i64: 1, 1, 128>}, {transform_indices = @transform_3, window_bounds = array<i64: 1, 8, 128>}, {transform_indices = @transform_4, window_bounds = array<i64: 8, 128>}, {transform_indices = @transform_5, window_bounds = array<i64: 1, 8, 128>}, {transform_indices = @transform_6, window_bounds = array<i64: 1, 8, 128>}]} {
    %c0_i32 = arith.constant 0 : i32
    %0 = arith.cmpi eq, %arg1, %c0_i32 : i32
    %1 = arith.extui %0 : i1 to i32
    %c0_i32_0 = arith.constant 0 : i32
    %2 = arith.cmpi ne, %1, %c0_i32_0 : i32
    scf.if %2 {
      %cst_28 = arith.constant 0.000000e+00 : f32
      %59 = vector.broadcast %cst_28 : f32 to vector<1x8x128xf32>
      %c0_29 = arith.constant 0 : index
      %c0_30 = arith.constant 0 : index
      %c0_31 = arith.constant 0 : index
      %60 = vector.load %arg8[%c0_29, %c0_30, %c0_31] : memref<1x8x128xf32, #tpu.memory_space<vmem>>, vector<1x8x128xf32>
      tpu.vector_store %arg8[%c0_29, %c0_30, %c0_31], %59 {strides = array<i32>} : memref<1x8x128xf32, #tpu.memory_space<vmem>>, vector<1x8x128xf32>,
      %cst_32 = arith.constant 0.000000e+00 : f32
      %61 = vector.broadcast %cst_32 : f32 to vector<1x8x128xf32>
      %c0_33 = arith.constant 0 : index
      %c0_34 = arith.constant 0 : index
      %c0_35 = arith.constant 0 : index
      %62 = vector.load %arg9[%c0_33, %c0_34, %c0_35] : memref<1x8x128xf32, #tpu.memory_space<vmem>>, vector<1x8x128xf32>
      tpu.vector_store %arg9[%c0_33, %c0_34, %c0_35], %61 {strides = array<i32>} : memref<1x8x128xf32, #tpu.memory_space<vmem>>, vector<1x8x128xf32>,
    } else {
    }
    %3 = arith.index_cast %arg0 : i32 to index
    %4 = memref.load %arg2[%3] : memref<2xi32, #tpu.memory_space<smem>>
    %c0_i32_1 = arith.constant 0 : i32
    %5 = arith.cmpi sgt, %4, %c0_i32_1 : i32
    %c0 = arith.constant 0 : index
    %c0_2 = arith.constant 0 : index
    %c0_3 = arith.constant 0 : index
    %6 = vector.load %arg3[%c0, %c0_2, %c0_3] : memref<1x8x128xf32, #tpu.memory_space<vmem>>, vector<1x8x128xf32>
    %7 = vector.shape_cast %6 : vector<1x8x128xf32> to vector<8x128xf32>
    %cst = arith.constant 9.99999974E-5 : f32
    %cst_4 = arith.constant 0.999899983 : f32
    %8 = vector.broadcast %cst : f32 to vector<8x128xf32>
    %9 = arith.maximumf %8, %7 : vector<8x128xf32>
    %10 = vector.broadcast %cst_4 : f32 to vector<8x128xf32>
    %11 = arith.minimumf %10, %9 : vector<8x128xf32>
    %c0_5 = arith.constant 0 : index
    %c0_6 = arith.constant 0 : index
    %c0_7 = arith.constant 0 : index
    %12 = vector.load %arg5[%c0_5, %c0_6, %c0_7] : memref<1x1x128xi32, #tpu.memory_space<vmem>>, vector<1x1x128xi32>
    %13 = vector.shape_cast %12 : vector<1x1x128xi32> to vector<1x128xi32>
    %c0_i32_8 = arith.constant 0 : i32
    %14 = vector.broadcast %c0_i32_8 : i32 to vector<1x128xi32>
    %15 = arith.cmpi sgt, %13, %14 : vector<1x128xi32>
    %c0_i32_9 = arith.constant 0 : i32
    %16 = vector.broadcast %c0_i32_9 : i32 to vector<1x128xi32>
    %17 = arith.cmpi sge, %13, %16 : vector<1x128xi32>
    %18 = math.log %11 : vector<8x128xf32>
    %cst_10 = arith.constant 1.000000e+00 : f32
    %19 = vector.broadcast %cst_10 : f32 to vector<8x128xf32>
    %20 = arith.subf %19, %11 : vector<8x128xf32>
    %21 = math.log %20 : vector<8x128xf32>
    %c0_11 = arith.constant 0 : index
    %c0_12 = arith.constant 0 : index
    %c0_13 = arith.constant 0 : index
    %22 = vector.load %arg6[%c0_11, %c0_12, %c0_13] : memref<1x8x128xf32, #tpu.memory_space<vmem>>, vector<1x8x128xf32>
    %23 = vector.shape_cast %22 : vector<1x8x128xf32> to vector<8x128xf32>
    %24 = vector.extract_strided_slice %23 {offsets = [0, 0], sizes = [8, 1], strides = [1, 1]} : vector<8x128xf32> to vector<8x1xf32>
    %cst_14 = arith.constant 5.000000e-01 : f32
    %25 = vector.broadcast %cst_14 : f32 to vector<8x1xf32>
    %26 = arith.cmpf ogt, %24, %25 : vector<8x1xf32>
    %27 = vector.broadcast %15 : vector<1x128xi1> to vector<8x128xi1>
    %28 = vector.broadcast %26 : vector<8x1xi1> to vector<8x128xi1>
    %29 = arith.andi %27, %28 : vector<8x128xi1>
    %cst_15 = arith.constant 2.500000e-01 : f32
    %cst_16 = arith.constant 7.500000e-01 : f32
    %30 = vector.broadcast %cst_15 : f32 to vector<8x128xf32>
    %31 = vector.broadcast %cst_16 : f32 to vector<8x128xf32>
    %32 = arith.select %29, %30, %31 : vector<8x128xi1>, vector<8x128xf32>
    %33 = arith.select %29, %21, %18 : vector<8x128xi1>, vector<8x128xf32>
    %cst_17 = arith.constant 2.500000e+00 : f32
    %34 = vector.broadcast %cst_17 : f32 to vector<8x128xf32>
    %35 = arith.mulf %34, %33 : vector<8x128xf32>
    %36 = math.exp %35 : vector<8x128xf32>
    %37 = arith.mulf %32, %36 : vector<8x128xf32>
    %38 = arith.select %29, %18, %21 : vector<8x128xi1>, vector<8x128xf32>
    %cst_18 = arith.constant 0.000000e+00 : f32
    %39 = vector.broadcast %cst_18 : f32 to vector<8x128xf32>
    %40 = arith.subf %39, %38 : vector<8x128xf32>
    %true = arith.constant true
    %41 = arith.xori %5, %true : i1
    %42 = vector.broadcast %41 : i1 to vector<1x128xi1>
    %43 = arith.ori %17, %42 : vector<1x128xi1>
    %c0_19 = arith.constant 0 : index
    %c0_20 = arith.constant 0 : index
    %c0_21 = arith.constant 0 : index
    %44 = vector.load %arg8[%c0_19, %c0_20, %c0_21] : memref<1x8x128xf32, #tpu.memory_space<vmem>>, vector<1x8x128xf32>
    %45 = arith.mulf %37, %40 : vector<8x128xf32>
    %cst_22 = arith.constant 0.000000e+00 : f32
    %46 = vector.shape_cast %43 : vector<1x128xi1> to vector<1x128xi1>
    %47 = vector.broadcast %46 : vector<1x128xi1> to vector<8x128xi1>
    %48 = vector.broadcast %cst_22 : f32 to vector<8x128xf32>
    %49 = arith.select %47, %45, %48 : vector<8x128xi1>, vector<8x128xf32>
    %50 = vector.shape_cast %49 : vector<8x128xf32> to vector<1x8x128xf32>
    %cst_23 = arith.constant dense<0.000000e+00> : vector<1xf32>
    %51 = vector.multi_reduction <add>, %50, %cst_23 [1, 2] : vector<1x8x128xf32> to vector<1xf32>
    %52 = vector.shape_cast %51 : vector<1xf32> to vector<1x1x1xf32>
    %53 = vector.extract %52[0, 0, 0] : f32 from vector<1x1x1xf32>
    %54 = vector.broadcast %53 : f32 to vector<1x8x128xf32>
    %55 = arith.addf %44, %54 : vector<1x8x128xf32>
    %c0_24 = arith.constant 0 : index
    %c0_25 = arith.constant 0 : index
    %c0_26 = arith.constant 0 : index
    %56 = vector.load %arg8[%c0_24, %c0_25, %c0_26] : memref<1x8x128xf32, #tpu.memory_space<vmem>>, vector<1x8x128xf32>
    tpu.vector_store %arg8[%c0_24, %c0_25, %c0_26], %55 {strides = array<i32>} : memref<1x8x128xf32, #tpu.memory_space<vmem>>, vector<1x8x128xf32>,
    %57 = arith.extui %5 : i1 to i32
    %c0_i32_27 = arith.constant 0 : i32
    %58 = arith.cmpi ne, %57, %c0_i32_27 : i32
    scf.if %58 {
      %c0_28 = arith.constant 0 : index
      %c0_29 = arith.constant 0 : index
      %c0_30 = arith.constant 0 : index
      %59 = vector.load %arg4[%c0_28, %c0_29, %c0_30] : memref<1x8x128xf32, #tpu.memory_space<vmem>>, vector<1x8x128xf32>
      %60 = vector.shape_cast %59 : vector<1x8x128xf32> to vector<8x128xf32>
      %c0_31 = arith.constant 0 : index
      %c0_32 = arith.constant 0 : index
      %61 = vector.load %arg7[%c0_31, %c0_32] : memref<8x128xf32, #tpu.memory_space<vmem>>, vector<8x128xf32>
      %62 = vector.extract_strided_slice %60 {offsets = [0, 0], sizes = [4, 128], strides = [1, 1]} : vector<8x128xf32> to vector<4x128xf32>
      %63 = vector.extract_strided_slice %60 {offsets = [4, 0], sizes = [4, 128], strides = [1, 1]} : vector<8x128xf32> to vector<4x128xf32>
      %64 = vector.extract_strided_slice %63 {offsets = [2, 0], sizes = [2, 128], strides = [1, 1]} : vector<4x128xf32> to vector<2x128xf32>
      %65 = vector.extract_strided_slice %63 {offsets = [0, 0], sizes = [2, 128], strides = [1, 1]} : vector<4x128xf32> to vector<2x128xf32>
      %66 = arith.subf %64, %65 : vector<2x128xf32>
      %67 = vector.extract_strided_slice %63 {offsets = [0, 0], sizes = [2, 128], strides = [1, 1]} : vector<4x128xf32> to vector<2x128xf32>
      %cst_33 = arith.constant 5.000000e-01 : f32
      %68 = vector.broadcast %cst_33 : f32 to vector<2x128xf32>
      %69 = arith.mulf %68, %66 : vector<2x128xf32>
      %70 = arith.addf %67, %69 : vector<2x128xf32>
      %71 = vector.extract_strided_slice %61 {offsets = [0, 0], sizes = [2, 128], strides = [1, 1]} : vector<8x128xf32> to vector<2x128xf32>
      %72 = arith.subf %70, %71 : vector<2x128xf32>
      %73 = vector.extract_strided_slice %61 {offsets = [2, 0], sizes = [2, 128], strides = [1, 1]} : vector<8x128xf32> to vector<2x128xf32>
      %74 = arith.mulf %72, %73 : vector<2x128xf32>
      %cst_34 = arith.constant 1.000000e+00 : f32
      %75 = vector.shape_cast %15 : vector<1x128xi1> to vector<1x128xi1>
      %76 = vector.broadcast %75 : vector<1x128xi1> to vector<2x128xi1>
      %77 = vector.broadcast %cst_34 : f32 to vector<2x128xf32>
      %78 = arith.select %76, %66, %77 : vector<2x128xi1>, vector<2x128xf32>
      %79 = math.log %78 : vector<2x128xf32>
      %80 = vector.extract_strided_slice %61 {offsets = [4, 0], sizes = [2, 128], strides = [1, 1]} : vector<8x128xf32> to vector<2x128xf32>
      %81 = arith.subf %79, %80 : vector<2x128xf32>
      %82 = vector.extract_strided_slice %62 {offsets = [0, 0], sizes = [2, 128], strides = [1, 1]} : vector<4x128xf32> to vector<2x128xf32>
      %83 = arith.subf %74, %82 : vector<2x128xf32>
      %84 = math.absf %83 : vector<2x128xf32>
      %cst_35 = arith.constant 1.000000e+00 : f32
      %85 = vector.broadcast %cst_35 : f32 to vector<2x128xf32>
      %86 = arith.cmpf olt, %84, %85 : vector<2x128xf32>
      %cst_36 = arith.constant 5.000000e-01 : f32
      %87 = vector.broadcast %cst_36 : f32 to vector<2x128xf32>
      %88 = arith.mulf %87, %84 : vector<2x128xf32>
      %89 = arith.mulf %88, %84 : vector<2x128xf32>
      %cst_37 = arith.constant 5.000000e-01 : f32
      %90 = vector.broadcast %cst_37 : f32 to vector<2x128xf32>
      %91 = arith.subf %84, %90 : vector<2x128xf32>
      %92 = arith.select %86, %89, %91 : vector<2x128xi1>, vector<2x128xf32>
      %93 = vector.extract_strided_slice %62 {offsets = [2, 0], sizes = [2, 128], strides = [1, 1]} : vector<4x128xf32> to vector<2x128xf32>
      %94 = arith.subf %81, %93 : vector<2x128xf32>
      %95 = math.absf %94 : vector<2x128xf32>
      %cst_38 = arith.constant 1.000000e+00 : f32
      %96 = vector.broadcast %cst_38 : f32 to vector<2x128xf32>
      %97 = arith.cmpf olt, %95, %96 : vector<2x128xf32>
      %cst_39 = arith.constant 5.000000e-01 : f32
      %98 = vector.broadcast %cst_39 : f32 to vector<2x128xf32>
      %99 = arith.mulf %98, %95 : vector<2x128xf32>
      %100 = arith.mulf %99, %95 : vector<2x128xf32>
      %cst_40 = arith.constant 5.000000e-01 : f32
      %101 = vector.broadcast %cst_40 : f32 to vector<2x128xf32>
      %102 = arith.subf %95, %101 : vector<2x128xf32>
      %103 = arith.select %97, %100, %102 : vector<2x128xi1>, vector<2x128xf32>
      %104 = arith.addf %92, %103 : vector<2x128xf32>
      %c0_41 = arith.constant 0 : index
      %c0_42 = arith.constant 0 : index
      %c0_43 = arith.constant 0 : index
      %105 = vector.load %arg9[%c0_41, %c0_42, %c0_43] : memref<1x8x128xf32, #tpu.memory_space<vmem>>, vector<1x8x128xf32>
      %cst_44 = arith.constant 0.000000e+00 : f32
      %106 = vector.shape_cast %15 : vector<1x128xi1> to vector<1x128xi1>
      %107 = vector.broadcast %106 : vector<1x128xi1> to vector<2x128xi1>
      %108 = vector.broadcast %cst_44 : f32 to vector<2x128xf32>
      %109 = arith.select %107, %104, %108 : vector<2x128xi1>, vector<2x128xf32>
      %110 = vector.shape_cast %109 : vector<2x128xf32> to vector<1x2x128xf32>
      %cst_45 = arith.constant dense<0.000000e+00> : vector<1xf32>
      %111 = vector.multi_reduction <add>, %110, %cst_45 [1, 2] : vector<1x2x128xf32> to vector<1xf32>
      %112 = vector.shape_cast %111 : vector<1xf32> to vector<1x1x1xf32>
      %113 = vector.extract %112[0, 0, 0] : f32 from vector<1x1x1xf32>
      %114 = vector.broadcast %113 : f32 to vector<1x8x128xf32>
      %115 = arith.addf %105, %114 : vector<1x8x128xf32>
      %c0_46 = arith.constant 0 : index
      %c0_47 = arith.constant 0 : index
      %c0_48 = arith.constant 0 : index
      %116 = vector.load %arg9[%c0_46, %c0_47, %c0_48] : memref<1x8x128xf32, #tpu.memory_space<vmem>>, vector<1x8x128xf32>
      tpu.vector_store %arg9[%c0_46, %c0_47, %c0_48], %115 {strides = array<i32>} : memref<1x8x128xf32, #tpu.memory_space<vmem>>, vector<1x8x128xf32>,
    } else {
    }
    return
  }
  func.func @transform_0(%arg0: i32, %arg1: i32, %arg2: memref<2xi32, #tpu.memory_space<smem>>) -> (i32, i32, i32) {
    %c0_i32 = arith.constant 0 : i32
    %c0_i32_0 = arith.constant 0 : i32
    return %arg0, %c0_i32, %arg1 : i32, i32, i32
  }
  func.func @transform_1(%arg0: i32, %arg1: i32, %arg2: memref<2xi32, #tpu.memory_space<smem>>) -> (i32, i32, i32) {
    %c0_i32 = arith.constant 0 : i32
    %c0_i32_0 = arith.constant 0 : i32
    return %arg0, %c0_i32, %arg1 : i32, i32, i32
  }
  func.func @transform_2(%arg0: i32, %arg1: i32, %arg2: memref<2xi32, #tpu.memory_space<smem>>) -> (i32, i32, i32) {
    %c0_i32 = arith.constant 0 : i32
    %c0_i32_0 = arith.constant 0 : i32
    return %arg0, %c0_i32, %arg1 : i32, i32, i32
  }
  func.func @transform_3(%arg0: i32, %arg1: i32, %arg2: memref<2xi32, #tpu.memory_space<smem>>) -> (i32, i32, i32) {
    %c0_i32 = arith.constant 0 : i32
    %c0_i32_0 = arith.constant 0 : i32
    %c0_i32_1 = arith.constant 0 : i32
    return %arg0, %c0_i32, %c0_i32_0 : i32, i32, i32
  }
  func.func @transform_4(%arg0: i32, %arg1: i32, %arg2: memref<2xi32, #tpu.memory_space<smem>>) -> (i32, i32) {
    %c0_i32 = arith.constant 0 : i32
    %c0_i32_0 = arith.constant 0 : i32
    return %c0_i32, %arg1 : i32, i32
  }
  func.func @transform_5(%arg0: i32, %arg1: i32, %arg2: memref<2xi32, #tpu.memory_space<smem>>) -> (i32, i32, i32) {
    %c0_i32 = arith.constant 0 : i32
    %c0_i32_0 = arith.constant 0 : i32
    %c0_i32_1 = arith.constant 0 : i32
    return %arg0, %c0_i32, %c0_i32_0 : i32, i32, i32
  }
  func.func @transform_6(%arg0: i32, %arg1: i32, %arg2: memref<2xi32, #tpu.memory_space<smem>>) -> (i32, i32, i32) {
    %c0_i32 = arith.constant 0 : i32
    %c0_i32_0 = arith.constant 0 : i32
    %c0_i32_1 = arith.constant 0 : i32
    return %arg0, %c0_i32, %c0_i32_0 : i32, i32, i32
  }
}

</mosaic_0001>

<bundles_post_ra>
// kernel: tpu_custom_call.1
= control target key start
LH: loop header
LB: loop body
LE: loop exit
PB: predicated region body
PF: predicated region fallthrough
CT: control target
= control target key end

     0   :  { %s1485_s0 = inlined_call_operand.hbm [shape: s32[2], index: 0, kind: input, shape index: {}]   ;;  %s1486_s1 = inlined_call_operand.hbm [shape: f32[2,8,128], index: 1, kind: input, shape index: {}]   ;;  %s1487_s2 = inlined_call_operand.hbm [shape: f32[2,8,128], index: 2, kind: input, shape index: {}]   ;;  %s1488_s3 = inlined_call_operand.vmem [shape: s32[2,1,128], index: 3, kind: input, shape index: {}]   ;;  %s1489_s4 = inlined_call_operand.hbm [shape: f32[2,8,128], index: 4, kind: input, shape index: {}]   ;;  %s1490_s5 = inlined_call_operand.vmem [shape: f32[8,128], index: 5, kind: input, shape index: {}]   ;;  %s1491_s6 = inlined_call_operand.hbm [shape: f32[2,8,128], index: 6, kind: output, shape index: {0}]   ;;  %s1492_s7 = inlined_call_operand.hbm [shape: f32[2,8,128], index: 7, kind: output, shape index: {1}]  }
   0x1   :  { %1503 = sst [smem:[#allocation24_spill]] %s1487_s2  ;;  %s879_s26 = scalar_lea.hbm %s1485_s0, 16 }
   0x2   :  { %p880_p0 = scmp.ne.s32.totalorder %s1485_s0, %s879_s26  ;;  %p883_p1 = scmp.lt.u32.totalorder %s879_s26, %s1485_s0 }
   0x4   :  { %p885_p2 = pnand %p883_p1, %p880_p0 }
   0x6   :  { %888 = shalt.err (!%p885_p2)  }
   0x7   :  { %s1101_s8 = smov [#allocation3]  }
   0x8   :  { %14 = dma.hbm_to_smem %s1485_s0, 16, %s1101_s8, [#allocation2] }
   0x9   :  { %1059 = dma.done.wait [#allocation2], 16 }
   0xa   :  { %1060 = vsyncadd [#allocation2], 4294967280 }
   0xb   :  { %16 = sfence }
   0xc   :  { %17 = vsyncpa [#allocation5], 0 }
   0xd   :  { %19 = vsyncpa [#allocation5 + $0x1], 0 }
   0xe   :  { %20 = vsyncpa [#allocation8], 0 }
   0xf   :  { %22 = vsyncpa [#allocation8 + $0x1], 0 }
  0x10   :  { %23 = vsyncpa [#allocation6], 0 }
  0x11   :  { %25 = vsyncpa [#allocation6 + $0x1], 0 }
  0x12   :  { %26 = vsyncpa [#allocation12], 0 }
  0x13   :  { %28 = vsyncpa [#allocation12 + $0x1], 0  ;;  %s1162_s11 = smov 0   ;;  %s1164_s12 = smov 0  }
  0x14   :  { %s1166_s13 = smov 0   ;;  %s1168_s14 = smov 0  }
  0x15   :  { %s1170_s0 = smov 0   ;;  %s1172_s15 = smov 0  }
  0x16 LB: > { %1504 = sst [smem:[#allocation18_spill]] %s1079_s11  ;;  %s1193_s16 = sadd.s32 4294967295, %s1099_s15   ;;  %s1099_s15 = sphi %s1172_s15, %s34_s15   ;;  %s1095_s0 = sphi %s1170_s0, %s1532_s0   ;;  %s1091_s14 = sphi %s1168_s14, %s1531_s14   ;;  %s1087_s13 = sphi %s1166_s13, %s1535_s13   ;;  %s1083_s12 = sphi %s1164_s12, %s1534_s12   ;;  %s1079_s11 = sphi %s1162_s11, %s1533_s11  }
  0x17   : > { %1505 = sst [smem:[#allocation19_spill]] %s1095_s0  ;;  %s760_s17 = sadd.s32 4294967294, %s1099_s15  }
  0x18   : > { %1506 = sst [smem:[#allocation20_spill]] %s1099_s15  ;;  %s46_s18 = sadd.s32 1, %s1095_s0 }
  0x19   : > { %s55_s19 = sadd.s32 1, %s1087_s13  ;;  %p48_p3 = scmp.ge.s32.totalorder %s46_s18, 2 }
  0x1a   : > { %p62_p4 = scmp.ne.s32.totalorder %s1087_s13, %s1083_s12  ;;  %p63_p5 = scmp.eq.s32.totalorder %s1099_s15, 0 }
  0x1b   : > { %p68_p6 = scmp.ne.s32.totalorder %s1083_s12, %s1079_s11  ;;  %s1537_s18 = smov (%p48_p3, %s46_s18), 0 }
  0x1c   : > { %1507 = sst [smem:[#allocation21_spill]] %s1537_s18  ;;  %p1205_p7 = por %p63_p5, %p62_p4 }
  0x1d   : > { %p69_p8 = scmp.eq.s32.totalorder %s1193_s16, 0  ;;  %s50_s21 = ssub.s32 %s1095_s0, %s1537_s18 }
  0x1e   : > { %p200_p9 = scmp.eq.s32.totalorder %s1193_s16, 1  ;;  %p53_p10 = scmp.eq.s32.totalorder %s50_s21, 0 }
  0x1f   : > { %p1213_p11 = por %p69_p8, %p68_p6  ;;  %p206_p13 = scmp.eq.s32.totalorder %s760_s17, 1 }
  0x20   : > { %p1217_p12 = por %p200_p9, %p62_p4  ;;  %p816_p2 = scmp.lt.s32.totalorder %s1099_s15, 2 }
  0x21   : > { %s1509_s22 = scalar_select %p1213_p11, 1, 0 }
  0x22   : > { %s1510_s23 = scalar_select %p1217_p12, 1, 0 }
  0x23   : > { %s1222_s24 = scalar_select %p53_p10, %s1087_s13, %s55_s19  }
  0x24   : > { %p1224_p0 = por %p206_p13, %p68_p6  ;;  %s1493_s26 = sand.u32 1, %s1087_s13  }
  0x25   : > { %1511 = sst [smem:[#allocation22_spill]] %s1222_s24  ;;  %s1233_s27 = sshll.u32 %s1493_s26, 3 }
  0x26   : > { %s1512_s25 = scalar_select %p1224_p0, 1, 0 }
  0x27   : > { %s1236_s28 = sshll.u32 %s1095_s0, 7  ;;  %p1240_p3 = pnand %p816_p2, %p1205_p7 }
  0x28   : > { %1513 = sst [smem:[#allocation23_spill]] %s1512_s25  ;;  %s278_s30 = sand.u32 1, %s1099_s15  }
  0x29   : > { %s1514_s29 = scalar_select %p1240_p3, 1, 0 }
  0x2a   : > { %s1515_s2 = sld [smem:[#allocation24_spill]]  ;;  %s282_s17 = scalar_lea.vmem [#allocation7], %s1233_s27 }
  0x2b   : > { %s290_s19 = sshll.u32 %s282_s17, 4  ;;  %s1256_s20 = scalar_lea.sflag [#allocation8], %s278_s30  ;;  %s1253_s19 = int_to_ptr.vmem [resolvable:$true] %s290_s19 }
  0x2c   : > { %p1262_p7 = pneg %p1240_p3 }
  0x30   : > { %s1249_s10 = scalar_lea.hbm %s1515_s2, %s1236_s28  ;;  %s894_s17 = scalar_lea.hbm %s1515_s2, 256 }
  0x31   : > { %s889_s21 = scalar_lea.hbm %s1249_s10, 128  ;;  %p895_p10 = scmp.lt.u32.totalorder %s1249_s10, %s1515_s2 }
  0x32   : > { %p890_p6 = scmp.ne.s32.totalorder %s1249_s10, %s889_s21  ;;  %p896_p13 = scmp.lt.u32.totalorder %s894_s17, %s889_s21 }
  0x33   : > { %p898_p1 = scmp.lt.u32.totalorder %s889_s21, %s1249_s10 }
  0x34   : > { %p892_p8 = pnand %p1262_p7, %p890_p6  ;;  %p897_p2 = por %p896_p13, %p895_p10 }
  0x36   : > { %p893_p9 = pneg %p892_p8  ;;  %p899_p4 = por %p898_p1, %p897_p2 }
  0x38   : > { %p900_p5 = pnand %p899_p4, %p893_p9 }
  0x3a   : > { %903 = shalt.err (!%p900_p5)
}
  0x3b   : > { %s904_s30 = scalar_lea.vmem %s1253_s19, 128  ;;  %s1102_s8 = smov [#allocation7]  }
  0x3c   : > { %p905_p6 = scmp.ne.s32.totalorder %s1253_s19, %s904_s30  ;;  %s909_s9 = sshll.u32 %s1102_s8, 4  ;;  %s910_s9 = int_to_ptr.vmem [resolvable:$false] %s909_s9 }
  0x3d   : > { %s911_s0 = scalar_lea.vmem %s910_s9, 256  ;;  %p912_p12 = scmp.lt.s32.totalorder %s1253_s19, %s910_s9 }
  0x3e   : > { %p907_p8 = pnand %p905_p6, %p1262_p7  ;;  %p913_p11 = scmp.lt.s32.totalorder %s911_s0, %s904_s30 }
  0x40   : > { %p908_p0 = pneg %p907_p8  ;;  %p914_p10 = por %p913_p11, %p912_p12 }
  0x42   : > { %p915_p13 = pnand %p914_p10, %p908_p0 }
  0x44   : > { %918 = shalt.err (!%p915_p13)
}
  0x45   : > { %805 = dma.hbm_to_vmem [thread:$0]  (!%p1240_p3), %s1249_s10, 128, %s1253_s19, %s1256_s20  }
  0x46   : > { %p1517_p1 = scmp.lt.s32.totalorder %s1099_s15, 3  ;;  %p1518_p4 = scmp.ge.s32.totalorder %s1099_s15, 1 }
  0x47   : > { %s1298_s30 = scalar_lea.hbm %s1486_s1, %s1236_s28  ;;  %s263_s8 = scalar_lea.vmem [#allocation4], %s1233_s27 }
  0x48   : > { %p1290_p5 = pnand %p1518_p4, %p1517_p1  ;;  %s271_s9 = sshll.u32 %s263_s8, 4  ;;  %s1301_s9 = int_to_ptr.vmem [resolvable:$true] %s271_s9 }
  0x49   : > { %s1307_s0 = scalar_lea.hbm %s1489_s4, %s1236_s28  ;;  %s1520_s2 = sand.u32 1, %s1087_s13  }
  0x4a   : > { %s1519_s18 = scalar_select %p1290_p5, 1, 0 }
  0x4b   : > { %s260_s24 = scalar_lea.sflag [#allocation5], %s1520_s2  ;;  %s919_s15 = scalar_lea.hbm %s1298_s30, 128 }
  0x4c   : > { %p920_p11 = scmp.ne.s32.totalorder %s1298_s30, %s919_s15  ;;  %s924_s25 = scalar_lea.hbm %s1486_s1, 256 }
  0x4d   : > { %p925_p9 = scmp.lt.u32.totalorder %s1298_s30, %s1486_s1  ;;  %p926_p2 = scmp.lt.u32.totalorder %s924_s25, %s919_s15 }
  0x4e   : > { %p922_p12 = pnand %p920_p11, %p1262_p7  ;;  %p928_p8 = scmp.lt.u32.totalorder %s919_s15, %s1298_s30 }
  0x4f   : > { %p927_p6 = por %p926_p2, %p925_p9 }
  0x50   : > { %p923_p0 = pneg %p922_p12 }
  0x51   : > { %p929_p10 = por %p928_p8, %p927_p6 }
  0x53   : > { %p930_p13 = pnand %p929_p10, %p923_p0 }
  0x55   : > { %933 = shalt.err (!%p930_p13)
}
  0x56   : > { %s934_s2 = scalar_lea.vmem %s1301_s9, 128  ;;  %s1103_s28 = smov [#allocation4]  }
  0x57   : > { %p935_p1 = scmp.ne.s32.totalorder %s1301_s9, %s934_s2  ;;  %s939_s10 = sshll.u32 %s1103_s28, 4  ;;  %s940_s10 = int_to_ptr.vmem [resolvable:$false] %s939_s10 }
  0x58   : > { %s941_s11 = scalar_lea.vmem %s940_s10, 256  ;;  %p942_p12 = scmp.lt.s32.totalorder %s1301_s9, %s940_s10 }
  0x59   : > { %p937_p4 = pnand %p935_p1, %p1262_p7  ;;  %p943_p5 = scmp.lt.s32.totalorder %s941_s11, %s934_s2 }
  0x5b   : > { %p938_p11 = pneg %p937_p4  ;;  %p944_p9 = por %p943_p5, %p942_p12 }
  0x5d   : > { %p945_p2 = pnand %p944_p9, %p938_p11 }
  0x5f   : > { %948 = shalt.err (!%p945_p2)
}
  0x60   : > { %802 = dma.hbm_to_vmem [thread:$0]  (!%p1240_p3), %s1298_s30, 128, %s1301_s9, %s260_s24  }
  0x61   : > { %s310_s15 = scalar_lea.vmem [#allocation9], %s1233_s27  ;;  %s949_s19 = scalar_lea.hbm %s1307_s0, 128 }
  0x62   : > { %s317_s25 = sshll.u32 %s310_s15, 4  ;;  %p950_p0 = scmp.ne.s32.totalorder %s1307_s0, %s949_s19  ;;  %s318_s25 = int_to_ptr.vmem [resolvable:$true] %s317_s25 }
  0x63   : > { %s954_s8 = scalar_lea.hbm %s1489_s4, 256  ;;  %p955_p8 = scmp.lt.u32.totalorder %s1307_s0, %s1489_s4 }
  0x64   : > { %p952_p5 = pnand %p950_p0, %p1262_p7  ;;  %p956_p10 = scmp.lt.u32.totalorder %s954_s8, %s949_s19 }
  0x65   : > { %p958_p1 = scmp.lt.u32.totalorder %s949_s19, %s1307_s0 }
  0x66   : > { %p953_p6 = pneg %p952_p5  ;;  %p957_p13 = por %p956_p10, %p955_p8 }
  0x68   : > { %p959_p4 = por %p958_p1, %p957_p13 }
  0x6a   : > { %p960_p11 = pnand %p959_p4, %p953_p6 }
  0x6c   : > { %963 = shalt.err (!%p960_p11)
}
  0x6d   : > { %s964_s24 = scalar_lea.vmem %s318_s25, 128  ;;  %s1104_s27 = smov [#allocation9]  }
  0x6e   : > { %p965_p12 = scmp.ne.s32.totalorder %s318_s25, %s964_s24  ;;  %s969_s30 = sshll.u32 %s1104_s27, 4  ;;  %s970_s30 = int_to_ptr.vmem [resolvable:$false] %s969_s30 }
  0x6f   : > { %s971_s9 = scalar_lea.vmem %s970_s30, 256  ;;  %p972_p0 = scmp.lt.s32.totalorder %s318_s25, %s970_s30 }
  0x70   : > { %p967_p9 = pnand %p965_p12, %p1262_p7  ;;  %p973_p5 = scmp.lt.s32.totalorder %s971_s9, %s964_s24 }
  0x72   : > { %p968_p2 = pneg %p967_p9  ;;  %p974_p3 = por %p973_p5, %p972_p0 }
  0x74   : > { %p975_p8 = pnand %p974_p3, %p968_p2 }
  0x76   : > { %978 = shalt.err (!%p975_p8)
}
  0x77   : > { %p1521_p10 = scmp.ne.s32.totalorder %s1514_s29, 0  ;;  %p1522_p6 = scmp.ne.s32.totalorder %s1519_s18, 0 }
  0x78   : > { %s1354_s26 = sand.u32 (!%p1522_p6), 1, %s1083_s12   ;;  %p1523_p3 = scmp.ne.s32.totalorder (!%p1522_p6), %s1509_s22, 0 }
  0x79   : > { %808 = dma.hbm_to_vmem [thread:$0]  (!%p1521_p10), %s1307_s0, 128, %s318_s25, %s1256_s20  }
  0x7a   : > { %326 = sbr.rel (%p1522_p6) target bundleno = 562 (0x232), region = 40  ;;  %s1357_s10 = sshll.u32 (!%p1522_p6), %s1354_s26, 3 }
  0x7b   : > { %s329_s11 = scalar_lea.sflag (!%p1522_p6), [#allocation5], %s1354_s26  ;;  %s332_s15 = scalar_lea.vmem (!%p1522_p6), [#allocation4], %s1357_s10 }
  0x81   : > { %1062 = dma.done.wait (%p1523_p3), %s329_s11, 128  }
  0x82   : > { %1064 = vsyncadd (%p1523_p3), %s329_s11, 4294967168  ;;  %s337_s29 = sand.u32 1, %s1193_s16   ;;  %s341_s18 = scalar_lea.vmem [#allocation7], %s1357_s10 }
  0x83   : > { %s338_s20 = scalar_lea.sflag [#allocation8], %s337_s29 }
  0x84   : > { %1066 = dma.done.wait (%p1523_p3), %s338_s20, 256  }
  0x85   : > { %1068 = vsyncadd (%p1523_p3), %s338_s20, 4294967040  ;;  %v1105_v0 = vmov 0   ;;  %s350_s0 = scalar_lea.vmem [#allocation9], %s1357_s10  ;;  %v422_v3 = vld [vmem:[%s332_s15] sm:$0xff]  ;;  %p404_p7 = scmp.lt.s32.totalorder %s1091_s14, 1  ;;  %v436_v7 = vlaneseq  ;;  %v1106_v26 = vmov 0.75  }
  0x86   : > { %870 = vset.pattern.permute.xlu0 %v1105_v0  ;;  %v433_v1 = vld [vmem:[%s350_s0] sm:$0xff]  ;;  %v423_v4 = vmax.f32 %v422_v3, 0.0001  ;;  %s1378_s21 = sld [smem:[#allocation3 + %s1091_s14]]  ;;  %s1389_s8 = scalar_lea.vmem [#allocation11], %s1357_s10  ;;  %v1107_v32 = vmov 0.0  }
  0x87   : > { %vm434_vm0 = vcmp.gt.f32.partialorder %v433_v1, 0.5  ;;  %s405_s16 = scalar_select %p404_p7, %s1091_s14, 1  ;;  %v437_v9 = vshrl.u32 %v436_v7, 7  ;;  %419 = vst [vmem:[%s1389_s8] sm:$0xff] %v1107_v32 }
  0x88   : > { %v441_v2 = vsel %vm434_vm0, 1, %v1105_v0  ;;  %v424_v5 = vmin.f32 %v423_v4, 0.9999  ;;  %s396_s28 = scalar_lea.vmem [#allocation10], %s1357_s10 }
  0x89   : > { %443 = vperm.xlu0 %870, %v441_v2   ;;  %s409_s19 = scalar_lea.vmem %s1488_s3, %s405_s16  ;;  %v438_v10 = vsub.s32 0, %v437_v9 }
  0x8a   : > { %v430_v6 = vsub.f32 1.0, %v424_v5  ;;  %871 = vlog2.f32 %v424_v5  ;;  %v425_v8 = vld [vmem:[%s409_s19] sm:$0x1] }
  0x8b   : > { %vm426_vm1 = vcmp.gt.s32.totalorder %v425_v8, 0  ;;  %vm427_vm5 = vcmp.ge.s32.totalorder %v425_v8, 0 }
  0x8c   : > { %873 = vlog2.f32 %v430_v6  ;;  %v435_v11 = vsel %vm426_vm1, 1, %v1105_v0  ;;  %p455_p13 = scmp.le.s32.totalorder %s1378_s21, 0 }
  0x8d   : > { %v1380_v13 = vrot.slane %v435_v11, %v438_v10  ;;  %v484_v41 = vld [vmem:[%s341_s18] sm:$0xff] (!%p455_p13)  ;;  %vm531_vm11 = vcmask (!%p455_p13), 1041408  }
  0x8e   : > { %s456_s17 = scalar_select %p455_p13, 1, 0  ;;  %v487_v42 = vrot.slane (!%p455_p13), %v484_v41, 6  ;;  %v485_v44 = vld [vmem:[%s1490_s5] sm:$0xff] (!%p455_p13)  ;;  %v506_v53 = vrot.slane (!%p455_p13), %v484_v41, 4 }
  0x8f   : > { %vm440_vm2 = vcmp.eq.s32.totalorder %v1380_v13, 1  ;;  %v496_v48 = vrot.slane (!%p455_p13), %v485_v44, 4  ;;  %v499_v51 = vrot.slane (!%p455_p13), %v485_v44, 6 }
  0x90   : > { %v457_v20 = vstv %s456_s17  ;;  %v489_v43 = vsub.f32 (!%p455_p13), %v484_v41, %v487_v42 }
  0x91   : > { %vm458_vm6 = vcmp.eq.s32.totalorder %v457_v20, 1 }
  0x92   : > { %vm459_vm7 = vmor %vm427_vm5, %vm458_vm6  ;;  %v490_v45 = vmul.f32 (!%p455_p13), 0.5, %v489_v43  ;;  %v502_v46 = vsel (!%p455_p13), %vm440_vm2, %v489_v43, 1.0 }
  0x93   : > { %v462_v22 = vsel %vm459_vm7, 1, %v1105_v0 }
  0x94   : > { %v872_v12 = vpop.eup %871  ;;  %v466_v24 = vrot.slane %v462_v22, %v438_v10  ;;  %v492_v47 = vrot.slane (!%p455_p13), %v490_v45, 2 }
  0x95   : > { %v429_v15 = vmul.f32 0.6931472, %v872_v12 }
  0x96   : > { %v874_v14 = vpop.eup %873  ;;  %vm467_vm8 = vcmp.eq.s32.totalorder %v466_v24, 1  ;;  %v494_v49 = vadd.f32 (!%p455_p13), %v492_v47, %v484_v41 }
  0x97   : > { %v432_v16 = vmul.f32 0.6931472, %v874_v14 }
  0x98   : > { %v498_v50 = vsub.f32 (!%p455_p13), %v494_v49, %v496_v48 }
  0x9a   : > { %v501_v52 = vmul.f32 (!%p455_p13), %v499_v51, %v498_v50 }
  0x9c   : > { %v508_v54 = vsub.f32 (!%p455_p13), %v501_v52, %v506_v53 }
  0x9e   : > { %v509_v57 = vand.u32 (!%p455_p13), 2147483647, %v508_v54 }
  0xa0   : > { %v511_v59 = vmul.f32 (!%p455_p13), 0.5, %v509_v57  ;;  %v777_v63 = vadd.f32 (!%p455_p13), -0.5, %v509_v57  ;;  %vm510_vm9 = vcmp.lt.f32.partialorder (!%p455_p13), %v509_v57, 1.0 }
  0xa2   : > { %v512_v62 = vmul.f32 (!%p455_p13), %v511_v59, %v509_v57 }
  0xa4   : > { %v514_v3 = vsel (!%p455_p13), %vm510_vm9, %v512_v62, %v777_v63 }
 0x108   : > { %v444_v17 = vpop.permute.xlu0 %443 }
 0x109   : > { %vm445_vm3 = vcmp.eq.s32.totalorder %v444_v17, 1 }
 0x10a   : > { %vm446_vm4 = vmand %vm440_vm2, %vm445_vm3 }
 0x10b   : > { %v448_v18 = vsel %vm446_vm4, %v432_v16, %v429_v15  ;;  %v453_v23 = vsel %vm446_vm4, %v429_v15, %v432_v16  ;;  %v447_v27 = vsel %vm446_vm4, 0.25, %v1106_v26 }
 0x10c   : > { %v449_v19 = vmul.f32 2.5, %v448_v18  ;;  %v454_v28 = vsub.f32 0.0, %v453_v23  ;;  %v526_v18 = vld [vmem:[%s1389_s8] sm:$0xff] (!%p455_p13) }
 0x10e   : > { %v450_v21 = vmul.f32 1.442695, %v449_v19 }
 0x110   : > { %875 = vpow2.f32 %v450_v21 }
 0x111   : > { %877 = vlog2.f32 (!%p455_p13), %v502_v46 }
 0x11a   : > { %v876_v25 = vpop.eup %875 }
 0x11b   : > { %v452_v29 = vmul.f32 %v876_v25, %v447_v27  ;;  %v878_v55 = vpop.eup (!%p455_p13), %877 }
 0x11c   : > { %v504_v56 = vmul.f32 (!%p455_p13), 0.6931472, %v878_v55 }
 0x11d   : > { %v461_v30 = vmul.f32 %v454_v28, %v452_v29 }
 0x11e   : > { %v505_v58 = vsub.f32 (!%p455_p13), %v504_v56, %v499_v51 }
 0x11f   : > { %v468_v31 = vsel %vm467_vm8, %v461_v30, 0.0 }
 0x120   : > { %469 = vadd.xlane.f32.xlu0 %v468_v31  ;;  %v515_v60 = vsub.f32 (!%p455_p13), %v505_v58, %v506_v53 }
 0x122   : > { %v516_v61 = vand.u32 (!%p455_p13), 2147483647, %v515_v60 }
 0x124   : > { %v518_v0 = vmul.f32 (!%p455_p13), 0.5, %v516_v61  ;;  %v778_v1 = vadd.f32 (!%p455_p13), -0.5, %v516_v61  ;;  %vm517_vm10 = vcmp.lt.f32.partialorder (!%p455_p13), %v516_v61, 1.0 }
 0x126   : > { %v519_v2 = vmul.f32 (!%p455_p13), %v518_v0, %v516_v61 }
 0x128   : > { %v521_v4 = vsel (!%p455_p13), %vm517_vm10, %v519_v2, %v778_v1 }
 0x129   : > { %v523_v5 = vrot.slane (!%p455_p13), %v521_v4, 2 }
 0x12b   : > { %v525_v6 = vadd.f32 (!%p455_p13), %v523_v5, %v514_v3 }
 0x12d   : > { %v527_v7 = vsel (!%p455_p13), %vm440_vm2, %v525_v6, 0.0 }
 0x12e   : > { %v529_v8 = vrot.slane (!%p455_p13), %v527_v7, 4 }
 0x130   : > { %v532_v9 = vsel (!%p455_p13), %vm531_vm11, %v529_v8, 0.0 }
 0x131   : > { %533 = vadd.xlane.f32.xlu0 (!%p455_p13), %v532_v9 }
 0x1ad   : > { %v470_v33 = vpop.xlane.xlu0 %469 }
 0x1ae   : > { %v471_v34 = vrot.slane %v470_v33, 4 }
 0x1b0   : > { %v472_v35 = vadd.f32 %v471_v34, %v470_v33 }
 0x1b2   : > { %v473_v36 = vrot.slane %v472_v35, 2 }
 0x1b4   : > { %v474_v37 = vadd.f32 %v473_v36, %v472_v35 }
 0x1b6   : > { %v475_v38 = vrot.slane %v474_v37, 1 }
 0x1b8   : > { %v476_v39 = vadd.f32 %v475_v38, %v474_v37 }
 0x1ba   : > { %785 = vpush %v476_v39 }
 0x1be   : > { %v534_v10 = vpop.xlane.xlu0 (!%p455_p13), %533 }
 0x1bf   : > { %v535_v11 = vrot.slane (!%p455_p13), %v534_v10, 4 }
 0x1c1   : > { %v536_v12 = vadd.f32 (!%p455_p13), %v535_v11, %v534_v10 }
 0x1c3   : > { %v537_v14 = vrot.slane (!%p455_p13), %v536_v12, 2 }
 0x1c5   : > { %v538_v15 = vadd.f32 (!%p455_p13), %v537_v14, %v536_v12 }
 0x1c7   : > { %v539_v16 = vrot.slane (!%p455_p13), %v538_v15, 1 }
 0x1c9   : > { %v540_v17 = vadd.f32 (!%p455_p13), %v539_v16, %v538_v15 }
 0x1cb   : > { %787 = vpush (!%p455_p13), %v540_v17 }
 0x1e7   : > { %483 = sbr.rel (%p455_p13) target bundleno = 513 (0x201), region = 60 }
 0x1eb   : > { %s786_s2 = spop %785 }
 0x1ec   : > { %v478_v40 = vstv %s786_s2 }
 0x1ed   : > { %480 = vst [vmem:[%s396_s28] sm:$0xff] %v478_v40 }
 0x1fc   : > { %s788_s30 = spop %787 }
 0x1fd   : > { %v542_v19 = vstv %s788_s30 }
 0x1fe   : > { %v543_v20 = vadd.f32 %v542_v19, %v526_v18 }
 0x200   : > { %544 = vst [vmem:[%s1389_s8] sm:$0xff] %v543_v20 }
 0x201 PF: > { %s781_s9 = sshll.u32 %s1091_s14, 7  ;;  %s564_s20 = sshll.u32 %s396_s28, 4  ;;  %s565_s20 = int_to_ptr.vmem [resolvable:$true] %s564_s20 }
 0x202   : > { %s1414_s29 = scalar_lea.hbm %s1491_s6, %s781_s9  ;;  %s546_s18 = scalar_lea.sflag [#allocation6], %s1354_s26 }
 0x203   : > { %s979_s0 = scalar_lea.vmem %s565_s20, 128  ;;  %p1524_p4 = scmp.ne.s32.totalorder %s1510_s23, 0 }
 0x204   : > { %p980_p1 = scmp.ne.s32.totalorder %s565_s20, %s979_s0  ;;  %s1108_s16 = smov [#allocation10]  }
 0x205   : > { %s983_s25 = sshll.u32 %s1108_s16, 4  ;;  %s984_s25 = int_to_ptr.vmem [resolvable:$false] %s983_s25 }
 0x206   : > { %p981_p11 = pnand %p980_p1, %p1524_p4  ;;  %s985_s22 = scalar_lea.vmem %s984_s25, 256 }
 0x207   : > { %p986_p9 = scmp.lt.s32.totalorder %s565_s20, %s984_s25  ;;  %p987_p2 = scmp.lt.s32.totalorder %s985_s22, %s979_s0 }
 0x208   : > { %p982_p12 = pneg %p981_p11 }
 0x209   : > { %p988_p0 = por %p987_p2, %p986_p9 }
 0x20b   : > { %p989_p5 = pnand %p988_p0, %p982_p12 }
 0x20d   : > { %992 = shalt.err (!%p989_p5)
}
 0x20e   : > { %s993_s10 = scalar_lea.hbm %s1414_s29, 128  ;;  %s997_s17 = scalar_lea.hbm %s1491_s6, 256 }
 0x20f   : > { %p994_p8 = scmp.ne.s32.totalorder %s1414_s29, %s993_s10  ;;  %p998_p3 = scmp.lt.u32.totalorder %s1414_s29, %s1491_s6 }
 0x210   : > { %p999_p7 = scmp.lt.u32.totalorder %s997_s17, %s993_s10  ;;  %p1001_p1 = scmp.lt.u32.totalorder %s993_s10, %s1414_s29 }
 0x211   : > { %p995_p10 = pnand %p994_p8, %p1524_p4 }
 0x212   : > { %p1000_p13 = por %p999_p7, %p998_p3 }
 0x213   : > { %p996_p6 = pneg %p995_p10 }
 0x214   : > { %p1002_p11 = por %p1001_p1, %p1000_p13 }
 0x216   : > { %p1003_p12 = pnand %p1002_p11, %p996_p6 }
 0x218   : > { %1006 = shalt.err (!%p1003_p12)
}
 0x219   : > { %795 = dma.vmem_to_hbm [thread:$0]  (%p1524_p4), %s565_s20, 128, %s1414_s29, %s546_s18  }
 0x21a   : > { %s1441_s30 = scalar_lea.hbm %s1492_s7, %s781_s9  ;;  %s577_s11 = sshll.u32 %s1389_s8, 4  ;;  %s578_s11 = int_to_ptr.vmem [resolvable:$true] %s577_s11 }
 0x21b   : > { %s551_s15 = scalar_lea.sflag [#allocation12], %s1354_s26  ;;  %s1007_s0 = scalar_lea.vmem %s578_s11, 128 }
 0x21c   : > { %p1008_p9 = scmp.ne.s32.totalorder %s578_s11, %s1007_s0  ;;  %s1109_s16 = smov [#allocation11]  }
 0x21d   : > { %s1011_s25 = sshll.u32 %s1109_s16, 4  ;;  %s1012_s25 = int_to_ptr.vmem [resolvable:$false] %s1011_s25 }
 0x21e   : > { %p1009_p2 = pnand %p1008_p9, %p1524_p4  ;;  %s1013_s22 = scalar_lea.vmem %s1012_s25, 256 }
 0x21f   : > { %p1014_p5 = scmp.lt.s32.totalorder %s578_s11, %s1012_s25  ;;  %p1015_p8 = scmp.lt.s32.totalorder %s1013_s22, %s1007_s0 }
 0x220   : > { %p1010_p0 = pneg %p1009_p2 }
 0x221   : > { %p1016_p10 = por %p1015_p8, %p1014_p5 }
 0x223   : > { %p1017_p6 = pnand %p1016_p10, %p1010_p0 }
 0x225   : > { %1020 = shalt.err (!%p1017_p6)
}
 0x226   : > { %s1021_s14 = scalar_lea.hbm %s1441_s30, 128  ;;  %s1025_s9 = scalar_lea.hbm %s1492_s7, 256 }
 0x227   : > { %p1022_p3 = scmp.ne.s32.totalorder %s1441_s30, %s1021_s14  ;;  %p1026_p1 = scmp.lt.u32.totalorder %s1441_s30, %s1492_s7 }
 0x228   : > { %p1027_p11 = scmp.lt.u32.totalorder %s1025_s9, %s1021_s14  ;;  %p1029_p9 = scmp.lt.u32.totalorder %s1021_s14, %s1441_s30 }
 0x229   : > { %p1023_p7 = pnand %p1022_p3, %p1524_p4 }
 0x22a   : > { %p1028_p12 = por %p1027_p11, %p1026_p1 }
 0x22b   : > { %p1024_p13 = pneg %p1023_p7 }
 0x22c   : > { %p1030_p2 = por %p1029_p9, %p1028_p12 }
 0x22e   : > { %p1031_p0 = pnand %p1030_p2, %p1024_p13 }
 0x230   : > { %1034 = shalt.err (!%p1031_p0)
}
 0x231   : > { %796 = dma.vmem_to_hbm [thread:$0]  (%p1524_p4), %s578_s11, 128, %s1441_s30, %s551_s15  }
 0x232 PF: > { %s1525_s18 = sld [smem:[#allocation18_spill]]  ;;  %s1526_s10 = sld [smem:[#allocation23_spill]] }
 0x233   : > { %s1527_s19 = sld [smem:[#allocation20_spill]] }
 0x238   : > { %s589_s21 = sand.u32 1, %s1525_s18   ;;  %p1528_p5 = scmp.ne.s32.totalorder %s1526_s10, 0 }
 0x239   : > { %p1529_p8 = scmp.ge.s32.totalorder %s1527_s19, 2  ;;  %s590_s17 = scalar_lea.sflag [#allocation6], %s589_s21 }
 0x23b   : > { %p810_p10 = pnand %p1529_p8, %p1528_p5 }
 0x23d   : > { %1070 = dma.done.wait (!%p810_p10), %s590_s17, 128  }
 0x23e   : > { %1072 = vsyncadd (!%p810_p10), %s590_s17, 4294967168  ;;  %s599_s2 = scalar_lea.sflag [#allocation12], %s589_s21 }
 0x23f   : > { %1074 = dma.done.wait (!%p810_p10), %s599_s2, 128  }
 0x240   : > { %1076 = vsyncadd (!%p810_p10), %s599_s2, 4294967168  ;;  %s34_s15 = sadd.s32 1, %s1527_s19   ;;  %s1530_s23 = sld [smem:[#allocation22_spill]] }
 0x241   : > { %p31_p6 = scmp.ge.s32.totalorder %s34_s15, 4   ;;  %s1531_s14 = sld [smem:[#allocation19_spill]] }
 0x242   : > { %s1532_s0 = sld [smem:[#allocation21_spill]]  ;;  %s1533_s11 = smov %s1083_s12 }
 0x243   : > { %s1534_s12 = smov %s1087_s13  ;;  %33 = sbr.rel (!%p31_p6) target bundleno = 22 (0x16), region = 140 }
 0x246   : > { %s1535_s13 = smov %s1530_s23 }
 0x24a   :  { %604 = vsyncpa [#allocation5], 1 }
 0x24b   :  { %606 = vsyncpa [#allocation5 + $0x1], 1 }
 0x24c   :  { %607 = vsyncpa [#allocation8], 1 }
 0x24d   :  { %609 = vsyncpa [#allocation8 + $0x1], 1 }
 0x24e   :  { %610 = vsyncpa [#allocation6], 1 }
 0x24f   :  { %612 = vsyncpa [#allocation6 + $0x1], 1 }
 0x250   :  { %613 = vsyncpa [#allocation12], 1 }
 0x251   :  { %615 = vsyncpa [#allocation12 + $0x1], 1 }

</bundles_post_ra>
